<compile_context>
chip_gen: v7x
topology: tpu7x:2x2x1
jax: 0.10.0
libtpu: 0.0.40
codegen_flags: <defaults>
</compile_context>

<pallas_src>
import jax
import jax.numpy as jnp
from jax.experimental import pallas as pl
from jax.experimental.pallas import tpu as pltpu


def _round_up(x, m):
    return ((x + m - 1) // m) * m


def decoder_kernel(x_ref, w1_ref, w2_ref, b12_ref, w3d_ref, gb_ref, m_ref, out_ref):
    hidden = w2_ref.shape[0]

    # Hidden layers: bf16 operands on the MXU, f32 accumulation, ReLU on the VPU.
    h = jnp.dot(x_ref[...], w1_ref[...], preferred_element_type=jnp.float32)
    h = jnp.maximum(h + b12_ref[:, :hidden], 0.0)
    h = jnp.dot(h.astype(jnp.bfloat16), w2_ref[...],
                preferred_element_type=jnp.float32)
    h = jnp.maximum(h + b12_ref[:, hidden:], 0.0)

    # Fused difference logit: d = h @ (W3a - W3b) + [(b3a - b3b) + (g0 - g1)].
    d = jnp.dot(h.astype(jnp.bfloat16), w3d_ref[...],
                preferred_element_type=jnp.float32) + gb_ref[...]

    # Hard gumbel-softmax class-0 indicator; ties -> class 0 (torch.argmax convention).
    edges = (d >= 0.0).astype(jnp.bfloat16)          # exact 0/1, single cast, (B, E_pad)

    # Scatter into the symmetric flattened adjacency via the MXU:
    # out[b, i*N+j] = out[b, j*N+i] = edges[b, e] for the e-th upper-tri pair.
    out_ref[...] = jnp.dot(edges, m_ref[...],
                           preferred_element_type=jnp.float32).astype(jnp.bfloat16)


def decoder_forward(x, params, g_diff, scatter_m, n_nodes):
    """x: (B, latent) f32, g_diff: (B, E) f32 (g0 - g1), scatter_m: (E_pad, nn_pad) bf16."""
    B, latent = x.shape
    w1, b12, w2, w3d, b3d = params
    hidden = w2.shape[0]
    E_pad = w3d.shape[1]
    E = g_diff.shape[1]
    nn = n_nodes * n_nodes
    nn_pad = scatter_m.shape[1]

    # Pad batch to a multiple of 16 sublanes (bf16 vregs pack [16,128]).
    B_pad = _round_up(max(B, 16), 16)
    x_p = jnp.zeros((B_pad, latent), jnp.bfloat16).at[:B].set(x.astype(jnp.bfloat16))
    # Fold the output-layer bias difference into the (padded) gumbel difference:
    # one fewer input DMA and one fewer VPU add inside the kernel.
    gb = jnp.zeros((B_pad, E_pad), jnp.float32).at[:B, :E].set(g_diff) + b3d

    inputs = (x_p, w1, w2, b12, w3d, gb, scatter_m)

    flops = 2 * B_pad * (latent * hidden + hidden * hidden
                         + hidden * E_pad + E_pad * nn_pad)
    bytes_accessed = sum(int(a.size) * a.dtype.itemsize for a in inputs) \
        + B_pad * nn_pad * 2

    vmem_spec = pl.BlockSpec(memory_space=pltpu.MemorySpace.VMEM)
    adj_flat = pl.pallas_call(
        decoder_kernel,
        out_shape=jax.ShapeDtypeStruct((B_pad, nn_pad), jnp.bfloat16),
        in_specs=[vmem_spec] * len(inputs),
        out_specs=vmem_spec,
        cost_estimate=pl.CostEstimate(flops=flops, transcendentals=0,
                                      bytes_accessed=bytes_accessed),
    )(*inputs)

    return adj_flat[:B, :nn].astype(jnp.float32).reshape(B, n_nodes, n_nodes)


def make_params(key, latent_dim, hidden_dim, n_nodes):
    E = n_nodes * (n_nodes - 1) // 2
    E_pad = _round_up(E, 32)                 # bf16 tile alignment for w3d / scatter rows
    ks = jax.random.split(key, 6)
    scale = 0.1
    w1 = scale * jax.random.normal(ks[0], (latent_dim, hidden_dim), jnp.float32)
    b1 = scale * jax.random.normal(ks[1], (1, hidden_dim), jnp.float32)
    w2 = scale * jax.random.normal(ks[2], (hidden_dim, hidden_dim), jnp.float32)
    b2 = scale * jax.random.normal(ks[3], (1, hidden_dim), jnp.float32)
    w3 = scale * jax.random.normal(ks[4], (hidden_dim, 2 * E), jnp.float32)
    b3 = scale * jax.random.normal(ks[5], (1, 2 * E), jnp.float32)
    # Fold the two gumbel-softmax class columns into a single difference layer
    # (class 0 columns are the even ones in the (..., E, 2) reshape view).
    w3d = w3[:, 0::2] - w3[:, 1::2]
    b3d = b3[:, 0::2] - b3[:, 1::2]
    # Zero-pad E -> E_pad: padded edge columns multiply all-zero scatter rows.
    w3d = jnp.zeros((hidden_dim, E_pad), jnp.float32).at[:, :E].set(w3d)
    b3d = jnp.zeros((1, E_pad), jnp.float32).at[:, :E].set(b3d)
    # Single (1, 2*hidden) bias buffer -> one DMA descriptor instead of two.
    b12 = jnp.concatenate([b1, b2], axis=1)
    # bf16 weights (single-pass MXU operands); biases stay in f32.
    return (w1.astype(jnp.bfloat16), b12,
            w2.astype(jnp.bfloat16),
            w3d.astype(jnp.bfloat16), b3d)


def make_scatter_matrix(n_nodes):
    rows, cols = jnp.triu_indices(n_nodes, k=1)
    E = rows.shape[0]
    E_pad = _round_up(E, 32)
    nn = n_nodes * n_nodes
    nn_pad = _round_up(max(nn, 128), 128)    # lane-dense output (unmasked stores)
    M = jnp.zeros((E_pad, nn_pad), jnp.float32)
    M = M.at[jnp.arange(E), rows * n_nodes + cols].set(1.0)
    M = M.at[jnp.arange(E), cols * n_nodes + rows].set(1.0)
    return M.astype(jnp.bfloat16)            # 0/1 values: exact in bf16


def reference_forward(x, params, g_diff, n_nodes):
    """Pure-JAX reference mirroring the kernel's numeric path (same bf16 casts)."""
    w1, b12, w2, w3d, b3d = params
    hidden = w2.shape[0]
    E = n_nodes * (n_nodes - 1) // 2
    h = jnp.maximum(jnp.dot(x.astype(jnp.bfloat16), w1,
                            preferred_element_type=jnp.float32) + b12[:, :hidden], 0.0)
    h = jnp.maximum(jnp.dot(h.astype(jnp.bfloat16), w2,
                            preferred_element_type=jnp.float32) + b12[:, hidden:], 0.0)
    d = jnp.dot(h.astype(jnp.bfloat16), w3d,
                preferred_element_type=jnp.float32)[:, :E] + b3d[:, :E] + g_diff
    edges = (d >= 0.0).astype(jnp.float32)
    B = x.shape[0]
    rows, cols = jnp.triu_indices(n_nodes, k=1)
    adj = jnp.zeros((B, n_nodes, n_nodes), jnp.float32)
    adj = adj.at[:, rows, cols].set(edges)
    adj = adj + jnp.transpose(adj, (0, 2, 1))
    return adj


if __name__ == "__main__":
    batch = 2
    latent_dim = 32
    hidden_dim = 64
    n_layers = 3          # MLP depth used above: 2 hidden (ReLU) + 1 output layer
    n_nodes = 8
    E = n_nodes * (n_nodes - 1) // 2

    key = jax.random.PRNGKey(0)
    k_x, k_p, k_g = jax.random.split(key, 3)

    x = jax.random.normal(k_x, (batch, latent_dim), jnp.float32)
    params = make_params(k_p, latent_dim, hidden_dim, n_nodes)
    scatter_m = make_scatter_matrix(n_nodes)

    # Gumbel(0,1) noise for the two softmax classes of each edge; only the
    # difference g0 - g1 matters for the hard argmax.
    u = jax.random.uniform(k_g, (2, batch, E), jnp.float32,
                           minval=1e-6, maxval=1.0 - 1e-6)
    g = -jnp.log(-jnp.log(u))
    g_diff = g[0] - g[1]

    adj = decoder_forward(x, params, g_diff, scatter_m, n_nodes)
    adj = jax.block_until_ready(adj)

    ref = reference_forward(x, params, g_diff, n_nodes)
    assert adj.shape == (batch, n_nodes, n_nodes)
    assert jnp.allclose(adj, ref), "Pallas kernel mismatch vs reference"
    # adjacency must be symmetric with zero diagonal and 0/1 entries
    assert jnp.allclose(adj, jnp.transpose(adj, (0, 2, 1)))
    assert jnp.allclose(jnp.diagonal(adj, axis1=1, axis2=2), 0.0)
    assert bool(jnp.all((adj == 0.0) | (adj == 1.0)))

    print("KERNEL_OK")
</pallas_src>

<mosaic_0001>
module attributes {stable_mosaic.version = 11 : i64} {
  func.func @decoder_kernel(%arg0: memref<16x32xbf16, #tpu.memory_space<vmem>>, %arg1: memref<32x64xbf16, #tpu.memory_space<vmem>>, %arg2: memref<64x64xbf16, #tpu.memory_space<vmem>>, %arg3: memref<1x128xf32, #tpu.memory_space<vmem>>, %arg4: memref<64x32xbf16, #tpu.memory_space<vmem>>, %arg5: memref<16x32xf32, #tpu.memory_space<vmem>>, %arg6: memref<32x128xbf16, #tpu.memory_space<vmem>>, %arg7: memref<16x128xbf16, #tpu.memory_space<vmem>>) attributes {dimension_semantics = [], scalar_prefetch = 0 : i64, scratch_operands = 0 : i64, tpu.core_type = #tpu.core_type<tc>} {
    %c0 = arith.constant 0 : index
    %c0_0 = arith.constant 0 : index
    %0 = vector.load %arg0[%c0, %c0_0] : memref<16x32xbf16, #tpu.memory_space<vmem>>, vector<16x32xbf16>
    %c0_1 = arith.constant 0 : index
    %c0_2 = arith.constant 0 : index
    %1 = vector.load %arg1[%c0_1, %c0_2] : memref<32x64xbf16, #tpu.memory_space<vmem>>, vector<32x64xbf16>
    %cst = arith.constant dense<0.000000e+00> : vector<16x64xf32>
    %2 = tpu.matmul %0, %1, %cst {dimension_numbers = #tpu.dot_dimension_numbers<[1], [0], [0], [1], [0, 0, 1, 1], [], []>} : vector<16x32xbf16>, vector<32x64xbf16>, vector<16x64xf32> -> vector<16x64xf32>
    %c0_3 = arith.constant 0 : index
    %c0_4 = arith.constant 0 : index
    %3 = vector.load %arg3[%c0_3, %c0_4] : memref<1x128xf32, #tpu.memory_space<vmem>>, vector<1x64xf32>
    %4 = vector.broadcast %3 : vector<1x64xf32> to vector<16x64xf32>
    %5 = arith.addf %2, %4 : vector<16x64xf32>
    %cst_5 = arith.constant 0.000000e+00 : f32
    %6 = vector.broadcast %cst_5 : f32 to vector<16x64xf32>
    %7 = arith.maximumf %5, %6 : vector<16x64xf32>
    %8 = arith.truncf %7 : vector<16x64xf32> to vector<16x64xbf16>
    %c0_6 = arith.constant 0 : index
    %c0_7 = arith.constant 0 : index
    %9 = vector.load %arg2[%c0_6, %c0_7] : memref<64x64xbf16, #tpu.memory_space<vmem>>, vector<64x64xbf16>
    %cst_8 = arith.constant dense<0.000000e+00> : vector<16x64xf32>
    %10 = tpu.matmul %8, %9, %cst_8 {dimension_numbers = #tpu.dot_dimension_numbers<[1], [0], [0], [1], [0, 0, 1, 1], [], []>} : vector<16x64xbf16>, vector<64x64xbf16>, vector<16x64xf32> -> vector<16x64xf32>
    %c0_9 = arith.constant 0 : index
    %c64 = arith.constant 64 : index
    %11 = vector.load %arg3[%c0_9, %c64] : memref<1x128xf32, #tpu.memory_space<vmem>>, vector<1x64xf32>
    %12 = vector.broadcast %11 : vector<1x64xf32> to vector<16x64xf32>
    %13 = arith.addf %10, %12 : vector<16x64xf32>
    %cst_10 = arith.constant 0.000000e+00 : f32
    %14 = vector.broadcast %cst_10 : f32 to vector<16x64xf32>
    %15 = arith.maximumf %13, %14 : vector<16x64xf32>
    %16 = arith.truncf %15 : vector<16x64xf32> to vector<16x64xbf16>
    %c0_11 = arith.constant 0 : index
    %c0_12 = arith.constant 0 : index
    %17 = vector.load %arg4[%c0_11, %c0_12] : memref<64x32xbf16, #tpu.memory_space<vmem>>, vector<64x32xbf16>
    %cst_13 = arith.constant dense<0.000000e+00> : vector<16x32xf32>
    %18 = tpu.matmul %16, %17, %cst_13 {dimension_numbers = #tpu.dot_dimension_numbers<[1], [0], [0], [1], [0, 0, 1, 1], [], []>} : vector<16x64xbf16>, vector<64x32xbf16>, vector<16x32xf32> -> vector<16x32xf32>
    %c0_14 = arith.constant 0 : index
    %c0_15 = arith.constant 0 : index
    %19 = vector.load %arg5[%c0_14, %c0_15] : memref<16x32xf32, #tpu.memory_space<vmem>>, vector<16x32xf32>
    %20 = arith.addf %18, %19 : vector<16x32xf32>
    %cst_16 = arith.constant 0.000000e+00 : f32
    %21 = vector.broadcast %cst_16 : f32 to vector<16x32xf32>
    %22 = arith.cmpf oge, %20, %21 : vector<16x32xf32>
    %23 = arith.extui %22 : vector<16x32xi1> to vector<16x32xi32>
    %24 = arith.sitofp %23 : vector<16x32xi32> to vector<16x32xf32>
    %25 = arith.truncf %24 : vector<16x32xf32> to vector<16x32xbf16>
    %c0_17 = arith.constant 0 : index
    %c0_18 = arith.constant 0 : index
    %26 = vector.load %arg6[%c0_17, %c0_18] : memref<32x128xbf16, #tpu.memory_space<vmem>>, vector<32x128xbf16>
    %cst_19 = arith.constant dense<0.000000e+00> : vector<16x128xf32>
    %27 = tpu.matmul %25, %26, %cst_19 {dimension_numbers = #tpu.dot_dimension_numbers<[1], [0], [0], [1], [0, 0, 1, 1], [], []>} : vector<16x32xbf16>, vector<32x128xbf16>, vector<16x128xf32> -> vector<16x128xf32>
    %28 = arith.truncf %27 : vector<16x128xf32> to vector<16x128xbf16>
    %c0_20 = arith.constant 0 : index
    %c0_21 = arith.constant 0 : index
    %29 = vector.load %arg7[%c0_20, %c0_21] : memref<16x128xbf16, #tpu.memory_space<vmem>>, vector<16x128xbf16>
    tpu.vector_store %arg7[%c0_20, %c0_21], %28 {strides = array<i32>} : memref<16x128xbf16, #tpu.memory_space<vmem>>, vector<16x128xbf16>,
    return
  }
}

</mosaic_0001>

<bundles_post_ra>
// kernel: tpu_custom_call.1
= control target key start
LH: loop header
LB: loop body
LE: loop exit
PB: predicated region body
PF: predicated region fallthrough
CT: control target
= control target key end

     0   :  { %12 = vsyncpa [#allocation3], 0  ;;  %s725_s0 = inlined_call_operand.hbm [shape: bf16[16,32], index: 0, kind: input, shape index: {}]   ;;  %s726_s1 = inlined_call_operand.vmem [shape: bf16[32,64], index: 1, kind: input, shape index: {}]   ;;  %s727_s2 = inlined_call_operand.vmem [shape: bf16[64,64], index: 2, kind: input, shape index: {}]   ;;  %s728_s3 = inlined_call_operand.vmem [shape: f32[1,128], index: 3, kind: input, shape index: {}]   ;;  %s729_s4 = inlined_call_operand.vmem [shape: bf16[64,32], index: 4, kind: input, shape index: {}]   ;;  %s730_s5 = inlined_call_operand.vmem [shape: f32[16,32], index: 5, kind: input, shape index: {}]   ;;  %s731_s6 = inlined_call_operand.hbm [shape: bf16[32,128], index: 6, kind: input, shape index: {}]   ;;  %s732_s7 = inlined_call_operand.hbm [shape: bf16[16,128], index: 7, kind: output, shape index: {}]  }
   0x1   :  { %13 = vsyncpa [#allocation6], 0 }
   0x2   :  { %14 = vsyncpa [#allocation4], 0  ;;  %s567_s24 = smov [#allocation2]   ;;  %s495_s28 = scalar_lea.hbm %s725_s0, 128 }
   0x3   :  { %s20_s25 = sshll.u32 %s567_s24, 4  ;;  %p496_p0 = scmp.ne.s32.totalorder %s725_s0, %s495_s28  ;;  %s21_s25 = int_to_ptr.vmem [resolvable:$true] %s20_s25 }
   0x4   :  { %p499_p1 = scmp.lt.u32.totalorder %s495_s28, %s725_s0 }
   0x6   :  { %p501_p2 = pnand %p499_p1, %p496_p0 }
   0x8   :  { %504 = shalt.err (!%p501_p2)
}
   0x9   :  { %s505_s10 = scalar_lea.vmem %s21_s25, 128  ;;  %p510_p4 = scmp.lt.s32.totalorder %s21_s25, %s21_s25 }
   0xa   :  { %p506_p3 = scmp.ne.s32.totalorder %s21_s25, %s505_s10  ;;  %p511_p5 = scmp.lt.s32.totalorder %s505_s10, %s505_s10 }
   0xc   :  { %p512_p6 = por %p511_p5, %p510_p4 }
   0xe   :  { %p513_p7 = pnand %p512_p6, %p506_p3 }
  0x10   :  { %516 = shalt.err (!%p513_p7)
}
  0x11   :  { %s568_s11 = smov 64   ;;  %s569_s12 = smov 4  }
  0x12   :  { %26 = dma.hbm_to_vmem [thread:$0]  %s725_s0, 128, %s21_s25, [#allocation3], %s568_s11, %s568_s11, %s569_s12  }
  0x13   :  { %s570_s15 = smov [#allocation5]   ;;  %s517_s19 = scalar_lea.hbm %s731_s6, 256 }
  0x14   :  { %s42_s16 = sshll.u32 %s570_s15, 4  ;;  %p518_p8 = scmp.ne.s32.totalorder %s731_s6, %s517_s19  ;;  %s43_s16 = int_to_ptr.vmem [resolvable:$true] %s42_s16 }
  0x15   :  { %p521_p9 = scmp.lt.u32.totalorder %s517_s19, %s731_s6 }
  0x17   :  { %p523_p10 = pnand %p521_p9, %p518_p8 }
  0x19   :  { %526 = shalt.err (!%p523_p10)
}
  0x1a   :  { %s527_s24 = scalar_lea.vmem %s43_s16, 256  ;;  %p532_p12 = scmp.lt.s32.totalorder %s43_s16, %s43_s16 }
  0x1b   :  { %p528_p11 = scmp.ne.s32.totalorder %s43_s16, %s527_s24  ;;  %p533_p13 = scmp.lt.s32.totalorder %s527_s24, %s527_s24 }
  0x1d   :  { %p534_p0 = por %p533_p13, %p532_p12 }
  0x1f   :  { %p535_p1 = pnand %p534_p0, %p528_p11 }
  0x21   :  { %538 = shalt.err (!%p535_p1)
}
  0x22   :  { %48 = dma.hbm_to_vmem [thread:$0]  %s731_s6, 256, %s43_s16, [#allocation6], %s568_s11, %s568_s11, %s569_s12  }
  0x23   :  { %561 = dma.done.wait [#allocation3], 128  }
  0x24   :  { %562 = vsyncadd [#allocation3], 4294967168 }
  0x25   :  { %563 = dma.done.wait [#allocation6], 256  }
  0x26   :  { %564 = vsyncadd [#allocation6], 4294967040  ;;  %v571_v0 = vmov 0.0   ;;  %vm572_vm0 = vmmov 0   ;;  %v482_v1 = vld [vmem:[%s726_s1] sm:$0xff]   ;;  %v483_v2 = vld [vmem:[%s726_s1 + $0x8] sm:$0xff]  }
  0x27   :  { %435 = vmatprep.subr.bf16.mxu0 %v571_v0  ;;  %439 = vmatprep.mubr.msk.bf16.mxu0 %vm572_vm0, %v571_v0  ;;  %v484_v3 = vld [vmem:[#allocation2] sm:$0xff]   ;;  %vm86_vm1 = vcmask 261120   ;;  %v486_v5 = vld [vmem:[%s727_s2 + $0x8] sm:$0xff]   ;;  %v487_v7 = vld [vmem:[%s727_s2 + $0x10] sm:$0xff]   ;;  %vm169_vm2 = vcmask 523264   ;;  %s573_s25 = smov [#allocation7]  }
  0x28   :  { %443 = vmatprep.subr.bf16.mxu1 %v571_v0  ;;  %451 = vmatprep.mubr.msk.bf16.mxu1 %vm572_vm0, %v571_v0  ;;  %v485_v4 = vld [vmem:[%s727_s2] sm:$0xff]   ;;  %v488_v8 = vld [vmem:[%s727_s2 + $0x18] sm:$0xff]   ;;  %v490_v10 = vld [vmem:[%s729_s4 + $0x8] sm:$0xff]   ;;  %s377_s26 = sshll.u32 %s573_s25, 4  ;;  %s378_s26 = int_to_ptr.vmem [resolvable:$true] %s377_s26 }
  0x29   :  { %436 = vmatpush3.bf16.msra.mxu0 %v482_v1  ;;  %444 = vmatpush3.bf16.msra.mxu1 %v485_v4  ;;  %v390_v6 = vld [vmem:[%s728_s3] ss:$0 sm:$0xff]  ;;  %v491_v20 = vld [vmem:[%s729_s4 + $0x10] sm:$0xff]   ;;  %v492_v21 = vld [vmem:[%s729_s4 + $0x18] sm:$0xff]   ;;  %p544_p3 = scmp.lt.s32.totalorder %s378_s26, %s378_s26 }
  0x2a   :  { %437 = vmatprep.subr.bf16.mxu0 %v571_v0  ;;  %445 = vmatprep.subr.bf16.mxu1 %v571_v0  ;;  %v489_v9 = vld [vmem:[%s729_s4] sm:$0xff]   ;;  %v493_v32 = vld [vmem:[#allocation5] sm:$0xff]   ;;  %v494_v33 = vld [vmem:[#allocation5 + $0x8] sm:$0xff]  }
  0x2b   :  { %166 = vrot.lane.b32.xlu0 %v390_v6, %s568_s11  ;;  %v225_v34 = vld [vmem:[%s730_s5] sm:$0xff]  ;;  %v226_v36 = vld [vmem:[%s730_s5 + $0x8] sm:$0xff]  ;;  %s539_s5 = scalar_lea.vmem %s378_s26, 128 }
  0x2c   :  { %p540_p2 = scmp.ne.s32.totalorder %s378_s26, %s539_s5  ;;  %p545_p4 = scmp.lt.s32.totalorder %s539_s5, %s539_s5 }
  0x2d   :  { %438 = vmatpush3.bf16.msra.mxu0 %v483_v2  ;;  %446 = vmatpush3.bf16.msra.mxu1 %v486_v5 }
  0x2e   :  { %455 = vmatprep.subr.bf16.mxu0 %v571_v0  ;;  %447 = vmatprep.subr.bf16.mxu1 %v571_v0  ;;  %p546_p5 = por %p545_p4, %p544_p3 }
  0x30   :  { %440 = vmatmul.mubr.msk.bf16.vlgmr.msra.gmra.mrb[0].mxu0 %vm86_vm1, %v484_v3  ;;  %p547_p6 = pnand %p546_p5, %p540_p2 }
  0x31   :  { %463 = vmatprep.mubr.msk.bf16.mxu0 %vm572_vm0, %v571_v0  ;;  %448 = vmatpush3.bf16.msra.mxu1 %v487_v7 }
  0x32   :  { %449 = vmatprep.subr.bf16.mxu1 %v571_v0  ;;  %456 = vmatpush3.bf16.msra.mxu0 %v489_v9 }
  0x33   :  { %457 = vmatprep.subr.bf16.mxu0 %v571_v0 }
  0x35   :  { %450 = vmatpush3.bf16.msra.mxu1 %v488_v8 }
  0x36   :  { %467 = vmatprep.subr.bf16.mxu1 %v571_v0  ;;  %458 = vmatpush3.bf16.msra.mxu0 %v490_v10 }
  0x37   :  { %459 = vmatprep.subr.bf16.mxu0 %v571_v0 }
  0x3a   :  { %460 = vmatpush3.bf16.msra.mxu0 %v491_v20 }
  0x3b   :  { %461 = vmatprep.subr.bf16.mxu0 %v571_v0 }
  0x3e   :  { %462 = vmatpush3.bf16.msra.mxu0 %v492_v21 }
  0x9d   :  { %v167_v22 = vpop.permute.xlu0 %166 }
 0x103   :  { %v124_v11 = vpop.f32.mrb[0].mxu0 }
 0x104   :  { %v125_v12 = vadd.f32 %v390_v6, %v124_v11  ;;  %v441_v13 = vpop.f32.mrb[1].mxu0 }
 0x105   :  { %v127_v14 = vpop.f32.mrb[2].mxu0 }
 0x106   :  { %v128_v15 = vadd.f32 %v390_v6, %v127_v14  ;;  %v442_v16 = vpop.f32.mrb[3].mxu0  ;;  %v131_v17 = vmax.f32 %v125_v12, 0.0 }
 0x108   :  { %v132_v18 = vmax.f32 %v128_v15, 0.0 }
 0x10a   :  { %v133_v19 = vpack.c.bf16 %v132_v18, %v131_v17 }
 0x10c   :  { %452 = vmatmul.mubr.msk.bf16.vlgmr.msra.gmra.mrb[0].mxu1 %vm169_vm2, %v133_v19 }
 0x10d   :  { %471 = vmatprep.mubr.msk.bf16.mxu1 %vm572_vm0, %v571_v0  ;;  %468 = vmatpush3.bf16.msra.mxu1 %v493_v32 }
 0x10e   :  { %469 = vmatprep.subr.bf16.mxu1 %v571_v0 }
 0x111   :  { %470 = vmatpush3.bf16.msra.mxu1 %v494_v33 }
 0x1df   :  { %v207_v23 = vpop.f32.mrb[0].mxu1 }
 0x1e0   :  { %v208_v24 = vadd.f32 %v207_v23, %v167_v22  ;;  %v453_v25 = vpop.f32.mrb[1].mxu1 }
 0x1e1   :  { %v210_v26 = vpop.f32.mrb[2].mxu1 }
 0x1e2   :  { %v211_v27 = vadd.f32 %v210_v26, %v167_v22  ;;  %v454_v28 = vpop.f32.mrb[3].mxu1  ;;  %v214_v29 = vmax.f32 %v208_v24, 0.0 }
 0x1e4   :  { %v215_v30 = vmax.f32 %v211_v27, 0.0 }
 0x1e6   :  { %v216_v31 = vpack.c.bf16 %v215_v30, %v214_v29 }
 0x1e8   :  { %464 = vmatmul.mubr.msk.bf16.vlgmr.msra.gmra.mrb[4].mxu0 %vm169_vm2, %v216_v31 }
 0x2bb   :  { %v288_v35 = vpop.f32.mrb[4].mxu0 }
 0x2bc   :  { %v289_v37 = vadd.f32 %v288_v35, %v225_v34  ;;  %v465_v38 = vpop.f32.mrb[5].mxu0 }
 0x2bd   :  { %v291_v39 = vpop.f32.mrb[6].mxu0 }
 0x2be   :  { %vm295_vm3 = vcmp.ge.f32.partialorder %v289_v37, 0.0  ;;  %v292_v40 = vadd.f32 %v291_v39, %v226_v36  ;;  %v466_v41 = vpop.f32.mrb[7].mxu0 }
 0x2bf   :  { %v405_v42 = vsel %vm295_vm3, 1.0, %v571_v0 }
 0x2c0   :  { %vm296_vm4 = vcmp.ge.f32.partialorder %v292_v40, 0.0 }
 0x2c1   :  { %v406_v43 = vsel %vm296_vm4, 1.0, %v571_v0 }
 0x2c2   :  { %v301_v44 = vpack.c.bf16 %v406_v43, %v405_v42 }
 0x2c4   :  { %472 = vmatmul.mubr.msk.bf16.vlgmr.msra.gmra.mrb[4].mxu1 %vm86_vm1, %v301_v44 }
 0x397   :  { %v355_v45 = vpop.f32.mrb[4].mxu1 }
 0x398   :  { %v473_v46 = vpop.f32.mrb[5].mxu1 }
 0x399   :  { %v358_v47 = vpop.f32.mrb[6].mxu1 }
 0x39a   :  { %v417_v48 = vpack.c.bf16 %v358_v47, %v355_v45  ;;  %v474_v49 = vpop.f32.mrb[7].mxu1 }
 0x39c   :  { %418 = vst [vmem:[#allocation7] sm:$0xff] %v417_v48  }
 0x39d   :  { %550 = shalt.err (!%p547_p6)
}
 0x39e   :  { %s551_s28 = scalar_lea.hbm %s732_s7, 128 }
 0x39f   :  { %p552_p7 = scmp.ne.s32.totalorder %s732_s7, %s551_s28  ;;  %p555_p8 = scmp.lt.u32.totalorder %s551_s28, %s732_s7 }
 0x3a1   :  { %p557_p9 = pnand %p555_p8, %p552_p7 }
 0x3a3   :  { %560 = shalt.err (!%p557_p9)
}
 0x3a4   :  { %383 = dma.vmem_to_hbm [thread:$0]  %s378_s26, 128, %s732_s7, [#allocation4], %s568_s11, %s568_s11, %s569_s12  }
 0x3a5   :  { %565 = dma.done.wait [#allocation4], 128  }
 0x3a6   :  { %566 = vsyncadd [#allocation4], 4294967168 }
 0x3a7   :  { %387 = vsyncpa [#allocation3], 1 }
 0x3a8   :  { %388 = vsyncpa [#allocation6], 1 }
 0x3a9   :  { %389 = vsyncpa [#allocation4], 1 }

</bundles_post_ra>
